<compile_context>
chip_gen: v5e
topology: v5e:2x2
jax: 0.10.0
libtpu: 0.0.40
codegen_flags: <defaults>
</compile_context>

<pallas_src>
import functools
import math

import jax
import jax.numpy as jnp
from jax.experimental import pallas as pl
from jax.experimental.pallas import tpu as pltpu


def _round_up(x, m):
    return (x + m - 1) // m * m


def _ffn_kernel(x_ref, *refs, n_layers, dout_pads, use_relu, final_dout,
                final_dout_pad, use_log_softmax):
    """Fused FFN: h = x; for each layer: h = h @ W + b (+ leaky_relu);
    writes `coverage` (pre-final-layer activation) and `res` (final layer,
    optionally log_softmax over the real output columns)."""
    w_refs = refs[:n_layers]
    b_ref = refs[n_layers]          # (8*, Dmax_pad) bias slab, row i = layer i bias
    res_ref = refs[n_layers + 1]
    cov_ref = refs[n_layers + 2]

    h = x_ref[...].astype(jnp.float32)

    if n_layers == 1:
        # model_0 is empty -> coverage is the input itself.
        cov_ref[...] = h.astype(cov_ref.dtype)

    for i in range(n_layers):
        w = w_refs[i][...]
        b = b_ref[i:i + 1, 0:dout_pads[i]]               # (1, dout_pad_i), static slice
        h = jnp.dot(h, w, preferred_element_type=jnp.float32) + b
        if use_relu[i]:
            # F.leaky_relu default negative_slope = 0.01
            h = jnp.where(h >= 0, h, 0.01 * h)
        if i == n_layers - 2:
            cov_ref[...] = h.astype(cov_ref.dtype)        # coverage (post-relu)

    if use_log_softmax:
        if final_dout != final_dout_pad:
            # Mask padded output columns so the reduction only sees real logits.
            col = jax.lax.broadcasted_iota(jnp.int32, h.shape, 1)
            h = jnp.where(col < final_dout, h, -jnp.inf)
        m = jnp.max(h, axis=1, keepdims=True)
        lse = m + jnp.log(jnp.sum(jnp.exp(h - m), axis=1, keepdims=True))
        h = h - lse                                       # padded cols = -inf, sliced off outside

    res_ref[...] = h.astype(res_ref.dtype)


class FFNPallas:
    """JAX/Pallas re-implementation of the PyTorch FFN module (fully fused)."""

    def __init__(self, input_features, layers, key):
        # Replicate the PyTorch __init__ list gymnastics:
        # layers.reverse(); layers.append(inputFeatures); layers.reverse()
        dims = list(layers)
        dims.reverse()
        dims.append(input_features)
        dims.reverse()                           # -> [input_features, *layers]

        self.dims = dims
        self.n_layers = len(dims) - 1
        self.dims_pad = [_round_up(d, 128) for d in dims]
        # layer i uses leaky_relu iff it is not the last layer
        self.use_relu = tuple(i < self.n_layers - 1 for i in range(self.n_layers))

        dmax_pad = max(self.dims_pad[1:])
        b_rows = _round_up(self.n_layers, 8)

        self.params_raw = []                     # unpadded, for reference checks
        w_pads = []
        b_slab = jnp.zeros((b_rows, dmax_pad), jnp.float32)
        for i in range(self.n_layers):
            key, k_w, k_b = jax.random.split(key, 3)
            fan_in = dims[i]
            bound = 1.0 / math.sqrt(fan_in)      # nn.Linear default init range
            w = jax.random.uniform(k_w, (dims[i], dims[i + 1]), jnp.float32,
                                   minval=-bound, maxval=bound)
            b = jax.random.uniform(k_b, (dims[i + 1],), jnp.float32,
                                   minval=-bound, maxval=bound)
            self.params_raw.append((w, b))
            w_pad = jnp.zeros((self.dims_pad[i], self.dims_pad[i + 1]),
                              jnp.float32).at[:dims[i], :dims[i + 1]].set(w)
            w_pads.append(w_pad)
            b_slab = b_slab.at[i, :dims[i + 1]].set(b)

        self.w_pads = w_pads
        self.b_slab = b_slab

    def __call__(self, x, use_softmax=False):
        B, Din = x.shape
        assert Din == self.dims[0]

        # Batch tiling: single grid step for small B, <=512-row tiles for big B
        # (larger tiles amortize the ~0.35us per-grid-step overhead; all layer
        #  widths here are one 128-lane tile so VMEM stays tiny).
        tile_b = min(_round_up(B, 8), 512)
        B_pad = _round_up(B, tile_b)
        d0_pad = self.dims_pad[0]
        x_pad = jnp.zeros((B_pad, d0_pad), x.dtype).at[:B, :Din].set(x)

        if self.n_layers >= 2:
            cov_real, cov_pad_dim = self.dims[-2], self.dims_pad[-2]
        else:
            cov_real, cov_pad_dim = self.dims[0], self.dims_pad[0]
        res_real, res_pad_dim = self.dims[-1], self.dims_pad[-1]

        grid = (B_pad // tile_b,)
        in_specs = [pl.BlockSpec((tile_b, d0_pad), lambda i: (i, 0))]
        for li in range(self.n_layers):
            din_p, dout_p = self.dims_pad[li], self.dims_pad[li + 1]
            # Constant block index -> weight stays resident in VMEM across steps.
            in_specs.append(pl.BlockSpec((din_p, dout_p), lambda i: (0, 0)))
        in_specs.append(pl.BlockSpec(self.b_slab.shape, lambda i: (0, 0)))

        out_specs = (
            pl.BlockSpec((tile_b, res_pad_dim), lambda i: (i, 0)),
            pl.BlockSpec((tile_b, cov_pad_dim), lambda i: (i, 0)),
        )
        out_shape = (
            jax.ShapeDtypeStruct((B_pad, res_pad_dim), x.dtype),
            jax.ShapeDtypeStruct((B_pad, cov_pad_dim), x.dtype),
        )

        flops = sum(2 * B_pad * self.dims_pad[i] * self.dims_pad[i + 1]
                    for i in range(self.n_layers))
        bytes_accessed = 4 * (x_pad.size + sum(int(w.size) for w in self.w_pads)
                              + int(self.b_slab.size)
                              + B_pad * (res_pad_dim + cov_pad_dim))
        transcendentals = B_pad * res_pad_dim if use_softmax else 0

        kernel = functools.partial(
            _ffn_kernel,
            n_layers=self.n_layers,
            dout_pads=tuple(self.dims_pad[1:]),
            use_relu=self.use_relu,
            final_dout=res_real,
            final_dout_pad=res_pad_dim,
            use_log_softmax=use_softmax,
        )

        res_pad, cov_pad = pl.pallas_call(
            kernel,
            out_shape=out_shape,
            grid=grid,
            in_specs=in_specs,
            out_specs=out_specs,
            compiler_params=pltpu.CompilerParams(
                dimension_semantics=("parallel",)),
            cost_estimate=pl.CostEstimate(
                flops=flops,
                transcendentals=transcendentals,
                bytes_accessed=bytes_accessed),
        )(x_pad, *self.w_pads, self.b_slab)

        res = res_pad[:B, :res_real]
        coverage = cov_pad[:B, :cov_real]
        return res, coverage

    # Pure-JAX reference (unpadded) for correctness checking.
    def reference(self, x, use_softmax=False):
        h = x
        for i in range(self.n_layers - 1):
            w, b = self.params_raw[i]
            h = h @ w + b
            h = jnp.where(h >= 0, h, 0.01 * h)
        coverage = h
        w, b = self.params_raw[-1]
        res = coverage @ w + b
        if use_softmax:
            res = jax.nn.log_softmax(res, axis=1)
        return res, coverage


if __name__ == "__main__":
    key = jax.random.PRNGKey(0)
    key, k_init, k_x = jax.random.split(key, 3)

    batch = 8
    input_features = 32
    layers = [64, 48, 16]     # final output has 16 features, coverage has 48

    ffn = FFNPallas(input_features, layers, k_init)
    x = jax.random.normal(k_x, (batch, input_features), dtype=jnp.float32)

    # Plain forward
    res, coverage = ffn(x, use_softmax=False)
    res = jax.block_until_ready(res)
    coverage = jax.block_until_ready(coverage)
    assert res.shape == (batch, 16)
    assert coverage.shape == (batch, 48)
    assert jnp.all(jnp.isfinite(res)) and jnp.all(jnp.isfinite(coverage))

    res_ref, cov_ref = ffn.reference(x, use_softmax=False)
    assert jnp.allclose(res, res_ref, rtol=1e-3, atol=1e-3)
    assert jnp.allclose(coverage, cov_ref, rtol=1e-3, atol=1e-3)

    # log_softmax path (padded columns are masked inside the kernel)
    res_sm, cov_sm = ffn(x, use_softmax=True)
    res_sm = jax.block_until_ready(res_sm)
    assert jnp.all(jnp.isfinite(res_sm))
    row_sums = jnp.sum(jnp.exp(res_sm), axis=1)
    assert jnp.allclose(row_sums, jnp.ones_like(row_sums), rtol=1e-4, atol=1e-4)
    res_sm_ref, _ = ffn.reference(x, use_softmax=True)
    assert jnp.allclose(res_sm, res_sm_ref, rtol=1e-3, atol=1e-3)

    print("KERNEL_OK")
</pallas_src>

<mosaic_0001>
module attributes {stable_mosaic.version = 11 : i64} {
  func.func @_ffn_kernel(%arg0: i32, %arg1: memref<8x128xf32, #tpu.memory_space<vmem>>, %arg2: memref<128x128xf32, #tpu.memory_space<vmem>>, %arg3: memref<128x128xf32, #tpu.memory_space<vmem>>, %arg4: memref<128x128xf32, #tpu.memory_space<vmem>>, %arg5: memref<8x128xf32, #tpu.memory_space<vmem>>, %arg6: memref<8x128xf32, #tpu.memory_space<vmem>>, %arg7: memref<8x128xf32, #tpu.memory_space<vmem>>) attributes {dimension_semantics = [#tpu.dimension_semantics<parallel>], iteration_bounds = array<i64: 1>, scalar_prefetch = 0 : i64, scratch_operands = 0 : i64, tpu.core_type = #tpu.core_type<tc>, window_params = [{transform_indices = @transform_0, window_bounds = array<i64: 8, 128>}, {pipeline_mode = #tpu.pipeline_mode<synchronous>, transform_indices = @transform_1, window_bounds = array<i64: 128, 128>}, {pipeline_mode = #tpu.pipeline_mode<synchronous>, transform_indices = @transform_2, window_bounds = array<i64: 128, 128>}, {pipeline_mode = #tpu.pipeline_mode<synchronous>, transform_indices = @transform_3, window_bounds = array<i64: 128, 128>}, {pipeline_mode = #tpu.pipeline_mode<synchronous>, transform_indices = @transform_4, window_bounds = array<i64: 8, 128>}, {transform_indices = @transform_5, window_bounds = array<i64: 8, 128>}, {transform_indices = @transform_6, window_bounds = array<i64: 8, 128>}]} {
    %c0 = arith.constant 0 : index
    %c0_0 = arith.constant 0 : index
    %0 = vector.load %arg1[%c0, %c0_0] : memref<8x128xf32, #tpu.memory_space<vmem>>, vector<8x128xf32>
    %c0_1 = arith.constant 0 : index
    %c0_2 = arith.constant 0 : index
    %1 = vector.load %arg2[%c0_1, %c0_2] : memref<128x128xf32, #tpu.memory_space<vmem>>, vector<128x128xf32>
    %c0_3 = arith.constant 0 : index
    %c0_4 = arith.constant 0 : index
    %2 = vector.load %arg5[%c0_3, %c0_4] : memref<8x128xf32, #tpu.memory_space<vmem>>, vector<1x128xf32>
    %cst = arith.constant dense<0.000000e+00> : vector<8x128xf32>
    %3 = tpu.matmul %0, %1, %cst {dimension_numbers = #tpu.dot_dimension_numbers<[1], [0], [0], [1], [0, 0, 1, 1], [], []>} : vector<8x128xf32>, vector<128x128xf32>, vector<8x128xf32> -> vector<8x128xf32>
    %4 = vector.broadcast %2 : vector<1x128xf32> to vector<8x128xf32>
    %5 = arith.addf %3, %4 : vector<8x128xf32>
    %cst_5 = arith.constant 0.000000e+00 : f32
    %6 = vector.broadcast %cst_5 : f32 to vector<8x128xf32>
    %7 = arith.cmpf oge, %5, %6 : vector<8x128xf32>
    %cst_6 = arith.constant 0.00999999977 : f32
    %8 = vector.broadcast %cst_6 : f32 to vector<8x128xf32>
    %9 = arith.mulf %8, %5 : vector<8x128xf32>
    %10 = arith.select %7, %5, %9 : vector<8x128xi1>, vector<8x128xf32>
    %c0_7 = arith.constant 0 : index
    %c0_8 = arith.constant 0 : index
    %11 = vector.load %arg3[%c0_7, %c0_8] : memref<128x128xf32, #tpu.memory_space<vmem>>, vector<128x128xf32>
    %c1 = arith.constant 1 : index
    %c0_9 = arith.constant 0 : index
    %12 = vector.load %arg5[%c1, %c0_9] : memref<8x128xf32, #tpu.memory_space<vmem>>, vector<1x128xf32>
    %cst_10 = arith.constant dense<0.000000e+00> : vector<8x128xf32>
    %13 = tpu.matmul %10, %11, %cst_10 {dimension_numbers = #tpu.dot_dimension_numbers<[1], [0], [0], [1], [0, 0, 1, 1], [], []>} : vector<8x128xf32>, vector<128x128xf32>, vector<8x128xf32> -> vector<8x128xf32>
    %14 = vector.broadcast %12 : vector<1x128xf32> to vector<8x128xf32>
    %15 = arith.addf %13, %14 : vector<8x128xf32>
    %cst_11 = arith.constant 0.000000e+00 : f32
    %16 = vector.broadcast %cst_11 : f32 to vector<8x128xf32>
    %17 = arith.cmpf oge, %15, %16 : vector<8x128xf32>
    %cst_12 = arith.constant 0.00999999977 : f32
    %18 = vector.broadcast %cst_12 : f32 to vector<8x128xf32>
    %19 = arith.mulf %18, %15 : vector<8x128xf32>
    %20 = arith.select %17, %15, %19 : vector<8x128xi1>, vector<8x128xf32>
    %c0_13 = arith.constant 0 : index
    %c0_14 = arith.constant 0 : index
    %21 = vector.load %arg7[%c0_13, %c0_14] : memref<8x128xf32, #tpu.memory_space<vmem>>, vector<8x128xf32>
    tpu.vector_store %arg7[%c0_13, %c0_14], %20 {strides = array<i32>} : memref<8x128xf32, #tpu.memory_space<vmem>>, vector<8x128xf32>,
    %c0_15 = arith.constant 0 : index
    %c0_16 = arith.constant 0 : index
    %22 = vector.load %arg4[%c0_15, %c0_16] : memref<128x128xf32, #tpu.memory_space<vmem>>, vector<128x128xf32>
    %c2 = arith.constant 2 : index
    %c0_17 = arith.constant 0 : index
    %23 = vector.load %arg5[%c2, %c0_17] : memref<8x128xf32, #tpu.memory_space<vmem>>, vector<1x128xf32>
    %cst_18 = arith.constant dense<0.000000e+00> : vector<8x128xf32>
    %24 = tpu.matmul %20, %22, %cst_18 {dimension_numbers = #tpu.dot_dimension_numbers<[1], [0], [0], [1], [0, 0, 1, 1], [], []>} : vector<8x128xf32>, vector<128x128xf32>, vector<8x128xf32> -> vector<8x128xf32>
    %25 = vector.broadcast %23 : vector<1x128xf32> to vector<8x128xf32>
    %26 = arith.addf %24, %25 : vector<8x128xf32>
    %c0_19 = arith.constant 0 : index
    %c0_20 = arith.constant 0 : index
    %27 = vector.load %arg6[%c0_19, %c0_20] : memref<8x128xf32, #tpu.memory_space<vmem>>, vector<8x128xf32>
    tpu.vector_store %arg6[%c0_19, %c0_20], %26 {strides = array<i32>} : memref<8x128xf32, #tpu.memory_space<vmem>>, vector<8x128xf32>,
    return
  }
  func.func @transform_0(%arg0: i32) -> (i32, i32) {
    %c0_i32 = arith.constant 0 : i32
    %c0_i32_0 = arith.constant 0 : i32
    return %arg0, %c0_i32 : i32, i32
  }
  func.func @transform_1(%arg0: i32) -> (i32, i32) {
    %c0_i32 = arith.constant 0 : i32
    %c0_i32_0 = arith.constant 0 : i32
    %c0_i32_1 = arith.constant 0 : i32
    return %c0_i32, %c0_i32_0 : i32, i32
  }
  func.func @transform_2(%arg0: i32) -> (i32, i32) {
    %c0_i32 = arith.constant 0 : i32
    %c0_i32_0 = arith.constant 0 : i32
    %c0_i32_1 = arith.constant 0 : i32
    return %c0_i32, %c0_i32_0 : i32, i32
  }
  func.func @transform_3(%arg0: i32) -> (i32, i32) {
    %c0_i32 = arith.constant 0 : i32
    %c0_i32_0 = arith.constant 0 : i32
    %c0_i32_1 = arith.constant 0 : i32
    return %c0_i32, %c0_i32_0 : i32, i32
  }
  func.func @transform_4(%arg0: i32) -> (i32, i32) {
    %c0_i32 = arith.constant 0 : i32
    %c0_i32_0 = arith.constant 0 : i32
    %c0_i32_1 = arith.constant 0 : i32
    return %c0_i32, %c0_i32_0 : i32, i32
  }
  func.func @transform_5(%arg0: i32) -> (i32, i32) {
    %c0_i32 = arith.constant 0 : i32
    %c0_i32_0 = arith.constant 0 : i32
    return %arg0, %c0_i32 : i32, i32
  }
  func.func @transform_6(%arg0: i32) -> (i32, i32) {
    %c0_i32 = arith.constant 0 : i32
    %c0_i32_0 = arith.constant 0 : i32
    return %arg0, %c0_i32 : i32, i32
  }
}

</mosaic_0001>

<bundles_post_ra>
// kernel: tpu_custom_call.1
= control target key start
LH: loop header
LB: loop body
LE: loop exit
PB: predicated region body
PF: predicated region fallthrough
CT: control target
= control target key end

     0   :  { %12 = vsyncpa [#allocation3], 0  ;;  %s511_s0 = inlined_call_operand.hbm [shape: f32[8,128], index: 0, kind: input, shape index: {}]   ;;  %s512_s1 = inlined_call_operand.hbm [shape: f32[128,128], index: 1, kind: input, shape index: {}]   ;;  %s513_s2 = inlined_call_operand.hbm [shape: f32[128,128], index: 2, kind: input, shape index: {}]   ;;  %s514_s3 = inlined_call_operand.hbm [shape: f32[128,128], index: 3, kind: input, shape index: {}]   ;;  %s515_s4 = inlined_call_operand.hbm [shape: f32[8,128], index: 4, kind: input, shape index: {}]   ;;  %s516_s5 = inlined_call_operand.hbm [shape: f32[8,128], index: 5, kind: output, shape index: {0}]   ;;  %s517_s6 = inlined_call_operand.hbm [shape: f32[8,128], index: 6, kind: output, shape index: {1}]  }
   0x1   :  { %13 = vsyncpa [#allocation6], 0 }
   0x2   :  { %14 = vsyncpa [#allocation9], 0 }
   0x3   :  { %15 = vsyncpa [#allocation4], 0  ;;  %s32_s23 = sshll.u32 %s512_s1, 4  ;;  %s33_s23 = int_to_ptr.hbm [resolvable:$true] %s32_s23 }
   0x4   :  { %16 = vsyncpa [#allocation13], 0  ;;  %s446_s24 = smov [#allocation5]   ;;  %s58_s28 = sshll.u32 %s514_s3, 4  ;;  %s59_s28 = int_to_ptr.hbm [resolvable:$true] %s58_s28 }
   0x5   :  { %s34_s25 = sshll.u32 %s446_s24, 4  ;;  %s447_s29 = smov 128   ;;  %s35_s25 = int_to_ptr.vmem [resolvable:$true] %s34_s25 }
   0x6   :  { %s448_s30 = smov 8   ;;  %s449_s7 = smov [#allocation8]  }
   0x7   :  { %40 = dma.hbm_to_vmem [thread:$0]  %s33_s23, 2048, %s35_s25, [#allocation6], %s447_s29, %s447_s29, %s448_s30  }
   0x8   :  { %s60_s8 = sshll.u32 %s449_s7, 4  ;;  %s22_s11 = sshll.u32 %s511_s0, 4  ;;  %s61_s8 = int_to_ptr.vmem [resolvable:$true] %s60_s8  ;;  %s23_s11 = int_to_ptr.hbm [resolvable:$true] %s22_s11 }
   0x9   :  { %66 = dma.hbm_to_vmem [thread:$0]  %s59_s28, 2048, %s61_s8, [#allocation9], %s447_s29, %s447_s29, %s448_s30  }
   0xa   :  { %s45_s13 = sshll.u32 %s513_s2, 4  ;;  %s450_s14 = smov [#allocation2]   ;;  %s46_s13 = int_to_ptr.hbm [resolvable:$true] %s45_s13 }
   0xb   :  { %s24_s15 = sshll.u32 %s450_s14, 4  ;;  %s451_s3 = smov [#allocation7]   ;;  %s25_s15 = int_to_ptr.vmem [resolvable:$true] %s24_s15 }
   0xc   :  { %27 = dma.hbm_to_vmem [thread:$0]  %s23_s11, 128, %s25_s15, [#allocation3]  }
   0xd   :  { %s47_s16 = sshll.u32 %s451_s3, 4  ;;  %s72_s19 = sshll.u32 %s515_s4, 4  ;;  %s48_s16 = int_to_ptr.vmem [resolvable:$true] %s47_s16  ;;  %s73_s19 = int_to_ptr.hbm [resolvable:$true] %s72_s19 }
   0xe   :  { %53 = dma.hbm_to_vmem [thread:$0]  %s46_s13, 2048, %s48_s16, [#allocation6], %s447_s29, %s447_s29, %s448_s30  }
   0xf   :  { %s452_s0 = smov [#allocation10]  }
  0x10   :  { %s74_s20 = sshll.u32 %s452_s0, 4  ;;  %s75_s20 = int_to_ptr.vmem [resolvable:$true] %s74_s20 }
  0x11   :  { %77 = dma.hbm_to_vmem [thread:$0]  %s73_s19, 128, %s75_s20, [#allocation9]  }
  0x12   :  { %436 = dma.done.wait [#allocation3], 128  }
  0x13   :  { %437 = vsyncadd [#allocation3], 4294967168 }
  0x14   :  { %438 = dma.done.wait [#allocation6], 4096  }
  0x15   :  { %439 = vsyncadd [#allocation6], 4294963200 }
  0x16   :  { %440 = dma.done.wait [#allocation9], 2176  }
  0x17   :  { %441 = vsyncadd [#allocation9], 4294965120  ;;  %v114_v0 = vld [vmem:[#allocation5 + $0x78] sm:$0xff]  ;;  %v113_v1 = vld [vmem:[#allocation5 + $0x70] sm:$0xff]  ;;  %s453_s2 = smov [#allocation12]   ;;  %s239_s23 = sshll.u32 %s517_s6, 4  ;;  %s240_s23 = int_to_ptr.hbm [resolvable:$true] %s239_s23 }
  0x18   :  { %117 = vmatpush.msra.mxu0 %v114_v0  ;;  %v112_v2 = vld [vmem:[#allocation5 + $0x68] sm:$0xff]  ;;  %v111_v3 = vld [vmem:[#allocation5 + $0x60] sm:$0xff]  ;;  %v155_v4 = vld [vmem:[#allocation7 + $0x78] sm:$0xff]  ;;  %s237_s4 = sshll.u32 %s453_s2, 4  ;;  %s454_s24 = smov [#allocation11]   ;;  %s238_s4 = int_to_ptr.vmem [resolvable:$true] %s237_s4 }
  0x19   :  { %v110_v5 = vld [vmem:[#allocation5 + $0x58] sm:$0xff]  ;;  %158 = vmatpush.msra.mxu1 %v155_v4  ;;  %v154_v6 = vld [vmem:[#allocation7 + $0x70] sm:$0xff]  ;;  %v153_v7 = vld [vmem:[#allocation7 + $0x68] sm:$0xff]  ;;  %s226_s25 = sshll.u32 %s454_s24, 4  ;;  %s228_s28 = sshll.u32 %s516_s5, 4  ;;  %s227_s25 = int_to_ptr.vmem [resolvable:$true] %s226_s25  ;;  %s229_s28 = int_to_ptr.hbm [resolvable:$true] %s228_s28 }
  0x1a   :  { %118 = vmatpush.msra.mxu0 %v113_v1  ;;  %v109_v8 = vld [vmem:[#allocation5 + $0x50] sm:$0xff]  ;;  %v152_v9 = vld [vmem:[#allocation7 + $0x60] sm:$0xff]  ;;  %v108_v10 = vld [vmem:[#allocation5 + $0x48] sm:$0xff] }
  0x1b   :  { %159 = vmatpush.msra.mxu1 %v154_v6  ;;  %v151_v11 = vld [vmem:[#allocation7 + $0x58] sm:$0xff]  ;;  %v107_v12 = vld [vmem:[#allocation5 + $0x40] sm:$0xff]  ;;  %v150_v13 = vld [vmem:[#allocation7 + $0x50] sm:$0xff] }
  0x1c   :  { %119 = vmatpush.msra.mxu0 %v112_v2  ;;  %v106_v14 = vld [vmem:[#allocation5 + $0x38] sm:$0xff]  ;;  %v149_v15 = vld [vmem:[#allocation7 + $0x48] sm:$0xff]  ;;  %v105_v16 = vld [vmem:[#allocation5 + $0x30] sm:$0xff] }
  0x1d   :  { %160 = vmatpush.msra.mxu1 %v153_v7  ;;  %v148_v17 = vld [vmem:[#allocation7 + $0x40] sm:$0xff]  ;;  %v104_v18 = vld [vmem:[#allocation5 + $0x28] sm:$0xff]  ;;  %v147_v19 = vld [vmem:[#allocation7 + $0x38] sm:$0xff] }
  0x1e   :  { %120 = vmatpush.msra.mxu0 %v111_v3  ;;  %v103_v20 = vld [vmem:[#allocation5 + $0x20] sm:$0xff]  ;;  %v146_v21 = vld [vmem:[#allocation7 + $0x30] sm:$0xff]  ;;  %v102_v22 = vld [vmem:[#allocation5 + $0x18] sm:$0xff] }
  0x1f   :  { %161 = vmatpush.msra.mxu1 %v152_v9  ;;  %v145_v23 = vld [vmem:[#allocation7 + $0x28] sm:$0xff]  ;;  %v101_v24 = vld [vmem:[#allocation5 + $0x10] sm:$0xff]  ;;  %v144_v25 = vld [vmem:[#allocation7 + $0x20] sm:$0xff] }
  0x20   :  { %121 = vmatpush.msra.mxu0 %v110_v5  ;;  %v100_v26 = vld [vmem:[#allocation5 + $0x8] sm:$0xff]  ;;  %v143_v27 = vld [vmem:[#allocation7 + $0x18] sm:$0xff]  ;;  %v99_v28 = vld [vmem:[#allocation5] sm:$0xff] }
  0x21   :  { %162 = vmatpush.msra.mxu1 %v151_v11  ;;  %v98_v29 = vld [vmem:[#allocation2] sm:$0xff]  ;;  %v142_v30 = vld [vmem:[#allocation7 + $0x10] sm:$0xff]  ;;  %v141_v31 = vld [vmem:[#allocation7 + $0x8] sm:$0xff] }
  0x22   :  { %122 = vmatpush.msra.mxu0 %v109_v8  ;;  %v140_v32 = vld [vmem:[#allocation7] sm:$0xff]  ;;  %v197_v33 = vld [vmem:[#allocation8 + $0x78] sm:$0xff]  ;;  %v196_v34 = vld [vmem:[#allocation8 + $0x70] sm:$0xff] }
  0x23   :  { %163 = vmatpush.msra.mxu1 %v150_v13  ;;  %200 = vmatpush.msra.mxu2 %v197_v33  ;;  %v195_v35 = vld [vmem:[#allocation8 + $0x68] sm:$0xff]  ;;  %v194_v36 = vld [vmem:[#allocation8 + $0x60] sm:$0xff]  ;;  %v193_v37 = vld [vmem:[#allocation8 + $0x58] sm:$0xff] }
  0x24   :  { %123 = vmatpush.msra.mxu0 %v108_v10  ;;  %v192_v38 = vld [vmem:[#allocation8 + $0x50] sm:$0xff]  ;;  %v191_v39 = vld [vmem:[#allocation8 + $0x48] sm:$0xff]  ;;  %v190_v40 = vld [vmem:[#allocation8 + $0x40] sm:$0xff] }
  0x25   :  { %164 = vmatpush.msra.mxu1 %v149_v15  ;;  %201 = vmatpush.msra.mxu2 %v196_v34  ;;  %v189_v41 = vld [vmem:[#allocation8 + $0x38] sm:$0xff]  ;;  %v188_v42 = vld [vmem:[#allocation8 + $0x30] sm:$0xff]  ;;  %v187_v43 = vld [vmem:[#allocation8 + $0x28] sm:$0xff] }
  0x26   :  { %124 = vmatpush.msra.mxu0 %v107_v12  ;;  %v186_v44 = vld [vmem:[#allocation8 + $0x20] sm:$0xff]  ;;  %v185_v45 = vld [vmem:[#allocation8 + $0x18] sm:$0xff]  ;;  %v184_v51 = vld [vmem:[#allocation8 + $0x10] sm:$0xff] }
  0x27   :  { %165 = vmatpush.msra.mxu1 %v148_v17  ;;  %202 = vmatpush.msra.mxu2 %v195_v35  ;;  %v265_v46 = vld [vmem:[#allocation10] ss:$0 sm:$0xff]  ;;  %v183_v52 = vld [vmem:[#allocation8 + $0x8] sm:$0xff]  ;;  %v266_v54 = vld [vmem:[#allocation10 + $0x1] ss:$0 sm:$0xff] }
  0x28   :  { %125 = vmatpush.msra.mxu0 %v106_v14  ;;  %v182_v53 = vld [vmem:[#allocation8] sm:$0xff] }
  0x29   :  { %166 = vmatpush.msra.mxu1 %v147_v19  ;;  %203 = vmatpush.msra.mxu2 %v194_v36  ;;  %v267_v59 = vld [vmem:[#allocation10 + $0x2] ss:$0 sm:$0xff] }
  0x2a   :  { %126 = vmatpush.msra.mxu0 %v105_v16 }
  0x2b   :  { %167 = vmatpush.msra.mxu1 %v146_v21  ;;  %204 = vmatpush.msra.mxu2 %v193_v37 }
  0x2c   :  { %127 = vmatpush.msra.mxu0 %v104_v18 }
  0x2d   :  { %168 = vmatpush.msra.mxu1 %v145_v23  ;;  %205 = vmatpush.msra.mxu2 %v192_v38 }
  0x2e   :  { %128 = vmatpush.msra.mxu0 %v103_v20 }
  0x2f   :  { %169 = vmatpush.msra.mxu1 %v144_v25  ;;  %206 = vmatpush.msra.mxu2 %v191_v39 }
  0x30   :  { %129 = vmatpush.msra.mxu0 %v102_v22 }
  0x31   :  { %170 = vmatpush.msra.mxu1 %v143_v27  ;;  %207 = vmatpush.msra.mxu2 %v190_v40 }
  0x32   :  { %130 = vmatpush.msra.mxu0 %v101_v24 }
  0x33   :  { %171 = vmatpush.msra.mxu1 %v142_v30  ;;  %208 = vmatpush.msra.mxu2 %v189_v41 }
  0x34   :  { %131 = vmatpush.msra.mxu0 %v100_v26 }
  0x35   :  { %172 = vmatpush.msra.mxu1 %v141_v31  ;;  %209 = vmatpush.msra.mxu2 %v188_v42 }
  0x36   :  { %132 = vmatpush.msra.mxu0 %v99_v28 }
  0x37   :  { %133 = vmatmul.f32.vlgmr.msra.gmra.mxu0 %v98_v29  ;;  %173 = vmatpush.msra.mxu1 %v140_v32 }
  0x38   :  { %210 = vmatpush.msra.mxu2 %v187_v43 }
  0x3a   :  { %211 = vmatpush.msra.mxu2 %v186_v44 }
  0x3c   :  { %212 = vmatpush.msra.mxu2 %v185_v45 }
  0x3e   :  { %213 = vmatpush.msra.mxu2 %v184_v51 }
  0x40   :  { %214 = vmatpush.msra.mxu2 %v183_v52 }
  0x42   :  { %215 = vmatpush.msra.mxu2 %v182_v53 }
  0xb4   :  { %v134_v47 = vpop.f32.mrf.mxu0 }
  0xb5   :  { %v135_v48 = vadd.f32 %v265_v46, %v134_v47 }
  0xb7   :  { %vm137_vm0 = vcmp.ge.f32.partialorder %v135_v48, 0.0  ;;  %v138_v49 = vmul.f32 0.01, %v135_v48 }
  0xb9   :  { %v139_v50 = vsel %vm137_vm0, %v135_v48, %v138_v49 }
  0xba   :  { %174 = vmatmul.f32.vlgmr.msra.gmra.mxu1 %v139_v50 }
 0x137   :  { %v175_v55 = vpop.f32.mrf.mxu1 }
 0x138   :  { %v176_v56 = vadd.f32 %v266_v54, %v175_v55 }
 0x13a   :  { %vm178_vm1 = vcmp.ge.f32.partialorder %v176_v56, 0.0  ;;  %v179_v57 = vmul.f32 0.01, %v176_v56 }
 0x13c   :  { %v180_v58 = vsel %vm178_vm1, %v176_v56, %v179_v57 }
 0x13d   :  { %181 = vst [vmem:[#allocation12] sm:$0xff] %v180_v58  ;;  %216 = vmatmul.f32.vlgmr.msra.gmra.mxu2 %v180_v58 }
 0x13e   :  { %242 = dma.vmem_to_hbm [thread:$0]  %s238_s4, 128, %s240_s23, [#allocation13]  }
 0x1c0   :  { %v217_v60 = vpop.f32.mrf.mxu2 }
 0x1c1   :  { %v218_v61 = vadd.f32 %v267_v59, %v217_v60 }
 0x1c3   :  { %220 = vst [vmem:[#allocation11] sm:$0xff] %v218_v61 }
 0x1c4   :  { %231 = dma.vmem_to_hbm [thread:$0]  %s227_s25, 128, %s229_s28, [#allocation4]  }
 0x1c5   :  { %442 = dma.done.wait [#allocation4], 128  }
 0x1c6   :  { %443 = vsyncadd [#allocation4], 4294967168 }
 0x1c7   :  { %444 = dma.done.wait [#allocation13], 128  }
 0x1c8   :  { %445 = vsyncadd [#allocation13], 4294967168 }
 0x1c9   :  { %251 = vsyncpa [#allocation3], 1 }
 0x1ca   :  { %252 = vsyncpa [#allocation6], 1 }
 0x1cb   :  { %253 = vsyncpa [#allocation9], 1 }
 0x1cc   :  { %254 = vsyncpa [#allocation4], 1 }
 0x1cd   :  { %255 = vsyncpa [#allocation13], 1 }

</bundles_post_ra>
